<compile_context>
chip_gen: v7x
topology: tpu7x:2x2x1
jax: 0.10.0
libtpu: 0.0.40
codegen_flags: <defaults>
</compile_context>

<pallas_src>
from functools import partial
import math

import jax
import jax.numpy as jnp
from jax import lax
from jax.experimental import pallas as pl
from jax.experimental.pallas import tpu as pltpu


def causal_self_attention_kernel(x_ref, wqkv_ref, bqkv_ref, wout_ref, bout_ref,
                                 gamma_ref, beta_ref, out_ref, ctx_ref,
                                 *, num_heads, head_dim, eps):
    x = x_ref[0]                                   # (S, D), model dtype (f32 here)
    S = x.shape[0]
    D = num_heads * head_dim
    mxu_dtype = wqkv_ref.dtype                     # bf16 (weights pre-cast in the wrapper)

    # ---- Fused QKV projection: one (S, D) @ (D, 3D) MXU op, bf16 operands, f32 accumulate.
    qkv = jnp.dot(x.astype(mxu_dtype), wqkv_ref[...],
                  preferred_element_type=jnp.float32)
    qkv = qkv + bqkv_ref[...]                      # (S, 3D), f32 (bias kept f32)

    # ---- Causal mask comparison built ONCE per grid step (shared by all heads).
    row = lax.broadcasted_iota(jnp.int32, (S, S), 0)
    col = lax.broadcasted_iota(jnp.int32, (S, S), 1)
    causal = col > row                             # bool (S, S): strict upper triangle

    scale = 1.0 / math.sqrt(head_dim)

    # ---- In-kernel head loop (static unroll; num_heads is small and known at trace time).
    for h in range(num_heads):
        off = h * head_dim
        # Fold the 1/sqrt(hd) scale into q (S*hd mults instead of S*S).
        q = (qkv[:, off:off + head_dim] * scale).astype(mxu_dtype)
        k = qkv[:, D + off:D + off + head_dim].astype(mxu_dtype)
        v = qkv[:, 2 * D + off:2 * D + off + head_dim].astype(mxu_dtype)

        # scores[t, s] = <q_t, k_s>, causal-masked in f32.
        scores = lax.dot_general(q, k, (((1,), (1,)), ((), ())),
                                 preferred_element_type=jnp.float32)
        scores = jnp.where(causal, jnp.float32(-1e30), scores)

        m = jnp.max(scores, axis=-1, keepdims=True)
        p = jnp.exp(scores - m)                    # unnormalized probs, f32
        l = jnp.sum(p, axis=-1, keepdims=True)

        # Deferred softmax normalization: normalize the (S, hd) context, not the (S, S) probs.
        ctx = jnp.dot(p.astype(mxu_dtype), v, preferred_element_type=jnp.float32)
        ctx = ctx * pl.reciprocal(l, approx=True)

        # Pack this head's context into its lane slice of the (S, D) slab.
        ctx_ref[:, off:off + head_dim] = ctx

    # ---- Single lane-dense output projection + bias + residual + LayerNorm (all heads at once).
    proj = jnp.dot(ctx_ref[...].astype(mxu_dtype), wout_ref[...],
                   preferred_element_type=jnp.float32)
    proj = proj + bout_ref[...]                    # f32
    res = x.astype(jnp.float32) + proj             # residual
    mean = jnp.mean(res, axis=-1, keepdims=True)
    var = jnp.mean(jnp.square(res - mean), axis=-1, keepdims=True)
    normed = (res - mean) * lax.rsqrt(var + eps)
    y = normed * gamma_ref[...] + beta_ref[...]
    out_ref[0] = y.astype(out_ref.dtype)


def causal_self_attention(x, wqkv, bqkv, wout, bout, gamma, beta, *,
                          num_heads, eps=1e-5, matmul_dtype=jnp.bfloat16):
    """x: (B, S, D); wqkv: (D, 3D) = [Wq.T | Wk.T | Wv.T]; bqkv: (1, 3D);
    wout: (D, D) = Wout.T; bout/gamma/beta: (1, D)."""
    B, S, D = x.shape
    assert D % num_heads == 0
    hd = D // num_heads

    # Cast weights once in the wrapper: native bf16 MXU operands + half the weight DMA.
    wqkv = wqkv.astype(matmul_dtype)
    wout = wout.astype(matmul_dtype)
    bqkv = bqkv.astype(jnp.float32)
    bout = bout.astype(jnp.float32)
    gamma = gamma.astype(jnp.float32)
    beta = beta.astype(jnp.float32)

    kern = partial(causal_self_attention_kernel,
                   num_heads=num_heads, head_dim=hd, eps=eps)
    return pl.pallas_call(
        kern,
        out_shape=jax.ShapeDtypeStruct((B, S, D), x.dtype),
        grid_spec=pltpu.PrefetchScalarGridSpec(
            num_scalar_prefetch=0,
            grid=(B,),
            in_specs=[
                pl.BlockSpec((1, S, D), lambda b: (b, 0, 0)),       # x (per batch)
                pl.BlockSpec((D, 3 * D), lambda b: (0, 0)),         # fused QKV weights
                pl.BlockSpec((1, 3 * D), lambda b: (0, 0)),         # fused QKV bias
                pl.BlockSpec((D, D), lambda b: (0, 0)),             # out-proj weights
                pl.BlockSpec((1, D), lambda b: (0, 0)),             # out-proj bias
                pl.BlockSpec((1, D), lambda b: (0, 0)),             # LN gamma
                pl.BlockSpec((1, D), lambda b: (0, 0)),             # LN beta
            ],
            out_specs=pl.BlockSpec((1, S, D), lambda b: (b, 0, 0)),
            scratch_shapes=[pltpu.VMEM((S, D), jnp.float32)],       # per-head ctx slab
        ),
        compiler_params=pltpu.CompilerParams(
            dimension_semantics=("parallel",),      # batch axis -> both TCs on v7x
            vmem_limit_bytes=64 * 1024 * 1024,      # v5e default (16 MiB) is too tight at larger S
        ),
    )(x, wqkv, bqkv, wout, bout, gamma, beta)


def reference_forward(x, Wq, bq, Wk, bk, Wv, bv, Wout, bout, gamma, beta,
                      num_heads, eps=1e-5):
    """Pure-JAX replica of the PyTorch module (eval mode)."""
    B, S, D = x.shape
    hd = D // num_heads
    q = (x @ Wq.T + bq).reshape(B, S, num_heads, hd).transpose(0, 2, 1, 3)
    k = (x @ Wk.T + bk).reshape(B, S, num_heads, hd).transpose(0, 2, 1, 3)
    v = (x @ Wv.T + bv).reshape(B, S, num_heads, hd).transpose(0, 2, 1, 3)
    scores = jnp.einsum('bhqd,bhkd->bhqk', q, k) / math.sqrt(hd)
    mask = jnp.triu(jnp.ones((S, S)), k=1)
    scores = jnp.where(mask == 1, -jnp.inf, scores)
    probs = jax.nn.softmax(scores, axis=-1)
    out = jnp.einsum('bhqk,bhkd->bhqd', probs, v)
    out = out.transpose(0, 2, 1, 3).reshape(B, S, D)
    out = out @ Wout.T + bout
    res = x + out
    mean = res.mean(-1, keepdims=True)
    var = ((res - mean) ** 2).mean(-1, keepdims=True)
    return (res - mean) / jnp.sqrt(var + eps) * gamma + beta


if __name__ == "__main__":
    # Small, module-consistent shapes. num_heads is a constructor argument; we use 4 heads
    # with d_model=128 so d_model % num_heads == 0 and D stays lane-dense (multiple of 128).
    B, S, D = 2, 8, 128
    H = 4
    hd = D // H

    key = jax.random.PRNGKey(0)
    kx, kq, kk, kv, ko, kbq, kbk, kbv, kbo = jax.random.split(key, 9)

    # Mimic torch.nn.Linear default init: uniform(-1/sqrt(in_features), +1/sqrt(in_features)).
    bound = 1.0 / math.sqrt(D)
    Wq = jax.random.uniform(kq, (D, D), jnp.float32, -bound, bound)   # (out, in)
    Wk = jax.random.uniform(kk, (D, D), jnp.float32, -bound, bound)
    Wv = jax.random.uniform(kv, (D, D), jnp.float32, -bound, bound)
    Wout = jax.random.uniform(ko, (D, D), jnp.float32, -bound, bound)
    bq = jax.random.uniform(kbq, (D,), jnp.float32, -bound, bound)
    bk = jax.random.uniform(kbk, (D,), jnp.float32, -bound, bound)
    bv = jax.random.uniform(kbv, (D,), jnp.float32, -bound, bound)
    bout = jax.random.uniform(kbo, (D,), jnp.float32, -bound, bound)
    gamma = jnp.ones((D,), jnp.float32)
    beta = jnp.zeros((D,), jnp.float32)

    x = jax.random.normal(kx, (B, S, D), jnp.float32)

    # Repack weights for the kernel:
    #   q = x @ Wq.T, k = x @ Wk.T, v = x @ Wv.T  ->  one (D, 3D) = [Wq.T | Wk.T | Wv.T].
    wqkv = jnp.concatenate([Wq.T, Wk.T, Wv.T], axis=1)                # (D, 3D)
    bqkv = jnp.concatenate([bq, bk, bv])[None, :]                     # (1, 3D)
    wout = Wout.T                                                     # (D, D)
    bout_k = bout[None, :]                                            # (1, D)
    gamma_k = gamma[None, :]
    beta_k = beta[None, :]

    out = causal_self_attention(x, wqkv, bqkv, wout, bout_k, gamma_k, beta_k, num_heads=H)
    out = jax.block_until_ready(out)

    with jax.default_matmul_precision("highest"):
        ref = reference_forward(x, Wq, bq, Wk, bk, Wv, bv, Wout, bout, gamma, beta, H)
    ref = jax.block_until_ready(ref)

    # bf16 MXU operands (native TPU matmul path) vs. an f32-highest reference: allow the
    # corresponding rounding error.
    err = float(jnp.max(jnp.abs(out - ref)))
    assert jnp.allclose(out, ref, atol=3e-2, rtol=3e-2), f"max abs err {err}"

    print("KERNEL_OK")
</pallas_src>

<mosaic_0001>
module attributes {stable_mosaic.version = 11 : i64} {
  func.func @causal_self_attention_kernel(%arg0: i32, %arg1: memref<1x8x128xf32, #tpu.memory_space<vmem>>, %arg2: memref<128x384xbf16, #tpu.memory_space<vmem>>, %arg3: memref<1x384xf32, #tpu.memory_space<vmem>>, %arg4: memref<128x128xbf16, #tpu.memory_space<vmem>>, %arg5: memref<1x128xf32, #tpu.memory_space<vmem>>, %arg6: memref<1x128xf32, #tpu.memory_space<vmem>>, %arg7: memref<1x128xf32, #tpu.memory_space<vmem>>, %arg8: memref<1x8x128xf32, #tpu.memory_space<vmem>>, %arg9: memref<8x128xf32, #tpu.memory_space<vmem>>) attributes {dimension_semantics = [#tpu.dimension_semantics<parallel>], iteration_bounds = array<i64: 2>, scalar_prefetch = 0 : i64, scratch_operands = 1 : i64, tpu.core_type = #tpu.core_type<tc>, window_params = [{transform_indices = @transform_0, window_bounds = array<i64: 1, 8, 128>}, {pipeline_mode = #tpu.pipeline_mode<synchronous>, transform_indices = @transform_1, window_bounds = array<i64: 128, 384>}, {pipeline_mode = #tpu.pipeline_mode<synchronous>, transform_indices = @transform_2, window_bounds = array<i64: 1, 384>}, {pipeline_mode = #tpu.pipeline_mode<synchronous>, transform_indices = @transform_3, window_bounds = array<i64: 128, 128>}, {pipeline_mode = #tpu.pipeline_mode<synchronous>, transform_indices = @transform_4, window_bounds = array<i64: 1, 128>}, {pipeline_mode = #tpu.pipeline_mode<synchronous>, transform_indices = @transform_5, window_bounds = array<i64: 1, 128>}, {pipeline_mode = #tpu.pipeline_mode<synchronous>, transform_indices = @transform_6, window_bounds = array<i64: 1, 128>}, {transform_indices = @transform_7, window_bounds = array<i64: 1, 8, 128>}]} {
    %c0 = arith.constant 0 : index
    %c0_0 = arith.constant 0 : index
    %c0_1 = arith.constant 0 : index
    %0 = vector.load %arg1[%c0, %c0_0, %c0_1] : memref<1x8x128xf32, #tpu.memory_space<vmem>>, vector<1x8x128xf32>
    %1 = vector.shape_cast %0 : vector<1x8x128xf32> to vector<8x128xf32>
    %2 = arith.truncf %1 : vector<8x128xf32> to vector<8x128xbf16>
    %c0_2 = arith.constant 0 : index
    %c0_3 = arith.constant 0 : index
    %3 = vector.load %arg2[%c0_2, %c0_3] : memref<128x384xbf16, #tpu.memory_space<vmem>>, vector<128x384xbf16>
    %cst = arith.constant dense<0.000000e+00> : vector<8x384xf32>
    %4 = tpu.matmul %2, %3, %cst {dimension_numbers = #tpu.dot_dimension_numbers<[1], [0], [0], [1], [0, 0, 1, 1], [], []>} : vector<8x128xbf16>, vector<128x384xbf16>, vector<8x384xf32> -> vector<8x384xf32>
    %c0_4 = arith.constant 0 : index
    %c0_5 = arith.constant 0 : index
    %5 = vector.load %arg3[%c0_4, %c0_5] : memref<1x384xf32, #tpu.memory_space<vmem>>, vector<1x384xf32>
    %6 = vector.broadcast %5 : vector<1x384xf32> to vector<8x384xf32>
    %7 = arith.addf %4, %6 : vector<8x384xf32>
    %8 = tpu.iota {dimensions = array<i32: 0>} : vector<8x8xi32>
    %9 = tpu.iota {dimensions = array<i32: 1>} : vector<8x8xi32>
    %10 = arith.cmpi sgt, %9, %8 : vector<8x8xi32>
    %11 = vector.extract_strided_slice %7 {offsets = [0, 0], sizes = [8, 32], strides = [1, 1]} : vector<8x384xf32> to vector<8x32xf32>
    %cst_6 = arith.constant 0.176776692 : f32
    %12 = vector.broadcast %cst_6 : f32 to vector<8x32xf32>
    %13 = arith.mulf %11, %12 : vector<8x32xf32>
    %14 = arith.truncf %13 : vector<8x32xf32> to vector<8x32xbf16>
    %15 = vector.extract_strided_slice %7 {offsets = [0, 128], sizes = [8, 32], strides = [1, 1]} : vector<8x384xf32> to vector<8x32xf32>
    %16 = arith.truncf %15 : vector<8x32xf32> to vector<8x32xbf16>
    %17 = vector.extract_strided_slice %7 {offsets = [0, 256], sizes = [8, 32], strides = [1, 1]} : vector<8x384xf32> to vector<8x32xf32>
    %18 = arith.truncf %17 : vector<8x32xf32> to vector<8x32xbf16>
    %cst_7 = arith.constant dense<0.000000e+00> : vector<8x8xf32>
    %19 = tpu.matmul %14, %16, %cst_7 {dimension_numbers = #tpu.dot_dimension_numbers<[1], [1], [0], [0], [0, 0, 1, 0], [], []>} : vector<8x32xbf16>, vector<8x32xbf16>, vector<8x8xf32> -> vector<8x8xf32>
    %cst_8 = arith.constant -1.000000e+30 : f32
    %20 = vector.broadcast %cst_8 : f32 to vector<8x8xf32>
    %21 = arith.select %10, %20, %19 : vector<8x8xi1>, vector<8x8xf32>
    %cst_9 = arith.constant dense<0xFF800000> : vector<8xf32>
    %22 = vector.multi_reduction <maximumf>, %21, %cst_9 [1] : vector<8x8xf32> to vector<8xf32>
    %23 = vector.shape_cast %22 : vector<8xf32> to vector<8x1xf32>
    %24 = vector.broadcast %23 : vector<8x1xf32> to vector<8x8xf32>
    %25 = arith.subf %21, %24 : vector<8x8xf32>
    %26 = math.exp %25 : vector<8x8xf32>
    %cst_10 = arith.constant dense<0.000000e+00> : vector<8xf32>
    %27 = vector.multi_reduction <add>, %26, %cst_10 [1] : vector<8x8xf32> to vector<8xf32>
    %28 = vector.shape_cast %27 : vector<8xf32> to vector<8x1xf32>
    %29 = arith.truncf %26 : vector<8x8xf32> to vector<8x8xbf16>
    %cst_11 = arith.constant dense<0.000000e+00> : vector<8x32xf32>
    %30 = tpu.matmul %29, %18, %cst_11 {dimension_numbers = #tpu.dot_dimension_numbers<[1], [0], [0], [1], [0, 0, 1, 1], [], []>} : vector<8x8xbf16>, vector<8x32xbf16>, vector<8x32xf32> -> vector<8x32xf32>
    %31 = tpu.reciprocal %28 {approx = true} : vector<8x1xf32> -> vector<8x1xf32>
    %32 = vector.broadcast %31 : vector<8x1xf32> to vector<8x32xf32>
    %33 = arith.mulf %30, %32 : vector<8x32xf32>
    %c0_12 = arith.constant 0 : index
    %c0_13 = arith.constant 0 : index
    %34 = vector.load %arg9[%c0_12, %c0_13] : memref<8x128xf32, #tpu.memory_space<vmem>>, vector<8x32xf32>
    tpu.vector_store %arg9[%c0_12, %c0_13], %33 {strides = array<i32>} : memref<8x128xf32, #tpu.memory_space<vmem>>, vector<8x32xf32>,
    %35 = vector.extract_strided_slice %7 {offsets = [0, 32], sizes = [8, 32], strides = [1, 1]} : vector<8x384xf32> to vector<8x32xf32>
    %cst_14 = arith.constant 0.176776692 : f32
    %36 = vector.broadcast %cst_14 : f32 to vector<8x32xf32>
    %37 = arith.mulf %35, %36 : vector<8x32xf32>
    %38 = arith.truncf %37 : vector<8x32xf32> to vector<8x32xbf16>
    %39 = vector.extract_strided_slice %7 {offsets = [0, 160], sizes = [8, 32], strides = [1, 1]} : vector<8x384xf32> to vector<8x32xf32>
    %40 = arith.truncf %39 : vector<8x32xf32> to vector<8x32xbf16>
    %41 = vector.extract_strided_slice %7 {offsets = [0, 288], sizes = [8, 32], strides = [1, 1]} : vector<8x384xf32> to vector<8x32xf32>
    %42 = arith.truncf %41 : vector<8x32xf32> to vector<8x32xbf16>
    %cst_15 = arith.constant dense<0.000000e+00> : vector<8x8xf32>
    %43 = tpu.matmul %38, %40, %cst_15 {dimension_numbers = #tpu.dot_dimension_numbers<[1], [1], [0], [0], [0, 0, 1, 0], [], []>} : vector<8x32xbf16>, vector<8x32xbf16>, vector<8x8xf32> -> vector<8x8xf32>
    %cst_16 = arith.constant -1.000000e+30 : f32
    %44 = vector.broadcast %cst_16 : f32 to vector<8x8xf32>
    %45 = arith.select %10, %44, %43 : vector<8x8xi1>, vector<8x8xf32>
    %cst_17 = arith.constant dense<0xFF800000> : vector<8xf32>
    %46 = vector.multi_reduction <maximumf>, %45, %cst_17 [1] : vector<8x8xf32> to vector<8xf32>
    %47 = vector.shape_cast %46 : vector<8xf32> to vector<8x1xf32>
    %48 = vector.broadcast %47 : vector<8x1xf32> to vector<8x8xf32>
    %49 = arith.subf %45, %48 : vector<8x8xf32>
    %50 = math.exp %49 : vector<8x8xf32>
    %cst_18 = arith.constant dense<0.000000e+00> : vector<8xf32>
    %51 = vector.multi_reduction <add>, %50, %cst_18 [1] : vector<8x8xf32> to vector<8xf32>
    %52 = vector.shape_cast %51 : vector<8xf32> to vector<8x1xf32>
    %53 = arith.truncf %50 : vector<8x8xf32> to vector<8x8xbf16>
    %cst_19 = arith.constant dense<0.000000e+00> : vector<8x32xf32>
    %54 = tpu.matmul %53, %42, %cst_19 {dimension_numbers = #tpu.dot_dimension_numbers<[1], [0], [0], [1], [0, 0, 1, 1], [], []>} : vector<8x8xbf16>, vector<8x32xbf16>, vector<8x32xf32> -> vector<8x32xf32>
    %55 = tpu.reciprocal %52 {approx = true} : vector<8x1xf32> -> vector<8x1xf32>
    %56 = vector.broadcast %55 : vector<8x1xf32> to vector<8x32xf32>
    %57 = arith.mulf %54, %56 : vector<8x32xf32>
    %c0_20 = arith.constant 0 : index
    %c32 = arith.constant 32 : index
    %58 = vector.load %arg9[%c0_20, %c32] : memref<8x128xf32, #tpu.memory_space<vmem>>, vector<8x32xf32>
    tpu.vector_store %arg9[%c0_20, %c32], %57 {strides = array<i32>} : memref<8x128xf32, #tpu.memory_space<vmem>>, vector<8x32xf32>,
    %59 = vector.extract_strided_slice %7 {offsets = [0, 64], sizes = [8, 32], strides = [1, 1]} : vector<8x384xf32> to vector<8x32xf32>
    %cst_21 = arith.constant 0.176776692 : f32
    %60 = vector.broadcast %cst_21 : f32 to vector<8x32xf32>
    %61 = arith.mulf %59, %60 : vector<8x32xf32>
    %62 = arith.truncf %61 : vector<8x32xf32> to vector<8x32xbf16>
    %63 = vector.extract_strided_slice %7 {offsets = [0, 192], sizes = [8, 32], strides = [1, 1]} : vector<8x384xf32> to vector<8x32xf32>
    %64 = arith.truncf %63 : vector<8x32xf32> to vector<8x32xbf16>
    %65 = vector.extract_strided_slice %7 {offsets = [0, 320], sizes = [8, 32], strides = [1, 1]} : vector<8x384xf32> to vector<8x32xf32>
    %66 = arith.truncf %65 : vector<8x32xf32> to vector<8x32xbf16>
    %cst_22 = arith.constant dense<0.000000e+00> : vector<8x8xf32>
    %67 = tpu.matmul %62, %64, %cst_22 {dimension_numbers = #tpu.dot_dimension_numbers<[1], [1], [0], [0], [0, 0, 1, 0], [], []>} : vector<8x32xbf16>, vector<8x32xbf16>, vector<8x8xf32> -> vector<8x8xf32>
    %cst_23 = arith.constant -1.000000e+30 : f32
    %68 = vector.broadcast %cst_23 : f32 to vector<8x8xf32>
    %69 = arith.select %10, %68, %67 : vector<8x8xi1>, vector<8x8xf32>
    %cst_24 = arith.constant dense<0xFF800000> : vector<8xf32>
    %70 = vector.multi_reduction <maximumf>, %69, %cst_24 [1] : vector<8x8xf32> to vector<8xf32>
    %71 = vector.shape_cast %70 : vector<8xf32> to vector<8x1xf32>
    %72 = vector.broadcast %71 : vector<8x1xf32> to vector<8x8xf32>
    %73 = arith.subf %69, %72 : vector<8x8xf32>
    %74 = math.exp %73 : vector<8x8xf32>
    %cst_25 = arith.constant dense<0.000000e+00> : vector<8xf32>
    %75 = vector.multi_reduction <add>, %74, %cst_25 [1] : vector<8x8xf32> to vector<8xf32>
    %76 = vector.shape_cast %75 : vector<8xf32> to vector<8x1xf32>
    %77 = arith.truncf %74 : vector<8x8xf32> to vector<8x8xbf16>
    %cst_26 = arith.constant dense<0.000000e+00> : vector<8x32xf32>
    %78 = tpu.matmul %77, %66, %cst_26 {dimension_numbers = #tpu.dot_dimension_numbers<[1], [0], [0], [1], [0, 0, 1, 1], [], []>} : vector<8x8xbf16>, vector<8x32xbf16>, vector<8x32xf32> -> vector<8x32xf32>
    %79 = tpu.reciprocal %76 {approx = true} : vector<8x1xf32> -> vector<8x1xf32>
    %80 = vector.broadcast %79 : vector<8x1xf32> to vector<8x32xf32>
    %81 = arith.mulf %78, %80 : vector<8x32xf32>
    %c0_27 = arith.constant 0 : index
    %c64 = arith.constant 64 : index
    %82 = vector.load %arg9[%c0_27, %c64] : memref<8x128xf32, #tpu.memory_space<vmem>>, vector<8x32xf32>
    tpu.vector_store %arg9[%c0_27, %c64], %81 {strides = array<i32>} : memref<8x128xf32, #tpu.memory_space<vmem>>, vector<8x32xf32>,
    %83 = vector.extract_strided_slice %7 {offsets = [0, 96], sizes = [8, 32], strides = [1, 1]} : vector<8x384xf32> to vector<8x32xf32>
    %cst_28 = arith.constant 0.176776692 : f32
    %84 = vector.broadcast %cst_28 : f32 to vector<8x32xf32>
    %85 = arith.mulf %83, %84 : vector<8x32xf32>
    %86 = arith.truncf %85 : vector<8x32xf32> to vector<8x32xbf16>
    %87 = vector.extract_strided_slice %7 {offsets = [0, 224], sizes = [8, 32], strides = [1, 1]} : vector<8x384xf32> to vector<8x32xf32>
    %88 = arith.truncf %87 : vector<8x32xf32> to vector<8x32xbf16>
    %89 = vector.extract_strided_slice %7 {offsets = [0, 352], sizes = [8, 32], strides = [1, 1]} : vector<8x384xf32> to vector<8x32xf32>
    %90 = arith.truncf %89 : vector<8x32xf32> to vector<8x32xbf16>
    %cst_29 = arith.constant dense<0.000000e+00> : vector<8x8xf32>
    %91 = tpu.matmul %86, %88, %cst_29 {dimension_numbers = #tpu.dot_dimension_numbers<[1], [1], [0], [0], [0, 0, 1, 0], [], []>} : vector<8x32xbf16>, vector<8x32xbf16>, vector<8x8xf32> -> vector<8x8xf32>
    %cst_30 = arith.constant -1.000000e+30 : f32
    %92 = vector.broadcast %cst_30 : f32 to vector<8x8xf32>
    %93 = arith.select %10, %92, %91 : vector<8x8xi1>, vector<8x8xf32>
    %cst_31 = arith.constant dense<0xFF800000> : vector<8xf32>
    %94 = vector.multi_reduction <maximumf>, %93, %cst_31 [1] : vector<8x8xf32> to vector<8xf32>
    %95 = vector.shape_cast %94 : vector<8xf32> to vector<8x1xf32>
    %96 = vector.broadcast %95 : vector<8x1xf32> to vector<8x8xf32>
    %97 = arith.subf %93, %96 : vector<8x8xf32>
    %98 = math.exp %97 : vector<8x8xf32>
    %cst_32 = arith.constant dense<0.000000e+00> : vector<8xf32>
    %99 = vector.multi_reduction <add>, %98, %cst_32 [1] : vector<8x8xf32> to vector<8xf32>
    %100 = vector.shape_cast %99 : vector<8xf32> to vector<8x1xf32>
    %101 = arith.truncf %98 : vector<8x8xf32> to vector<8x8xbf16>
    %cst_33 = arith.constant dense<0.000000e+00> : vector<8x32xf32>
    %102 = tpu.matmul %101, %90, %cst_33 {dimension_numbers = #tpu.dot_dimension_numbers<[1], [0], [0], [1], [0, 0, 1, 1], [], []>} : vector<8x8xbf16>, vector<8x32xbf16>, vector<8x32xf32> -> vector<8x32xf32>
    %103 = tpu.reciprocal %100 {approx = true} : vector<8x1xf32> -> vector<8x1xf32>
    %104 = vector.broadcast %103 : vector<8x1xf32> to vector<8x32xf32>
    %105 = arith.mulf %102, %104 : vector<8x32xf32>
    %c0_34 = arith.constant 0 : index
    %c96 = arith.constant 96 : index
    %106 = vector.load %arg9[%c0_34, %c96] : memref<8x128xf32, #tpu.memory_space<vmem>>, vector<8x32xf32>
    tpu.vector_store %arg9[%c0_34, %c96], %105 {strides = array<i32>} : memref<8x128xf32, #tpu.memory_space<vmem>>, vector<8x32xf32>,
    %c0_35 = arith.constant 0 : index
    %c0_36 = arith.constant 0 : index
    %107 = vector.load %arg9[%c0_35, %c0_36] : memref<8x128xf32, #tpu.memory_space<vmem>>, vector<8x128xf32>
    %108 = arith.truncf %107 : vector<8x128xf32> to vector<8x128xbf16>
    %c0_37 = arith.constant 0 : index
    %c0_38 = arith.constant 0 : index
    %109 = vector.load %arg4[%c0_37, %c0_38] : memref<128x128xbf16, #tpu.memory_space<vmem>>, vector<128x128xbf16>
    %cst_39 = arith.constant dense<0.000000e+00> : vector<8x128xf32>
    %110 = tpu.matmul %108, %109, %cst_39 {dimension_numbers = #tpu.dot_dimension_numbers<[1], [0], [0], [1], [0, 0, 1, 1], [], []>} : vector<8x128xbf16>, vector<128x128xbf16>, vector<8x128xf32> -> vector<8x128xf32>
    %c0_40 = arith.constant 0 : index
    %c0_41 = arith.constant 0 : index
    %111 = vector.load %arg5[%c0_40, %c0_41] : memref<1x128xf32, #tpu.memory_space<vmem>>, vector<1x128xf32>
    %112 = vector.broadcast %111 : vector<1x128xf32> to vector<8x128xf32>
    %113 = arith.addf %110, %112 : vector<8x128xf32>
    %114 = arith.addf %1, %113 : vector<8x128xf32>
    %cst_42 = arith.constant dense<0.000000e+00> : vector<8xf32>
    %115 = vector.multi_reduction <add>, %114, %cst_42 [1] : vector<8x128xf32> to vector<8xf32>
    %116 = vector.shape_cast %115 : vector<8xf32> to vector<8x1xf32>
    %cst_43 = arith.constant 1.280000e+02 : f32
    %117 = vector.broadcast %cst_43 : f32 to vector<8x1xf32>
    %118 = arith.divf %116, %117 : vector<8x1xf32>
    %119 = vector.broadcast %118 : vector<8x1xf32> to vector<8x128xf32>
    %120 = arith.subf %114, %119 : vector<8x128xf32>
    %121 = arith.mulf %120, %120 : vector<8x128xf32>
    %cst_44 = arith.constant dense<0.000000e+00> : vector<8xf32>
    %122 = vector.multi_reduction <add>, %121, %cst_44 [1] : vector<8x128xf32> to vector<8xf32>
    %123 = vector.shape_cast %122 : vector<8xf32> to vector<8x1xf32>
    %cst_45 = arith.constant 1.280000e+02 : f32
    %124 = vector.broadcast %cst_45 : f32 to vector<8x1xf32>
    %125 = arith.divf %123, %124 : vector<8x1xf32>
    %126 = vector.broadcast %118 : vector<8x1xf32> to vector<8x128xf32>
    %127 = arith.subf %114, %126 : vector<8x128xf32>
    %cst_46 = arith.constant 9.99999974E-6 : f32
    %128 = vector.broadcast %cst_46 : f32 to vector<8x1xf32>
    %129 = arith.addf %125, %128 : vector<8x1xf32>
    %130 = math.rsqrt %129 : vector<8x1xf32>
    %131 = vector.broadcast %130 : vector<8x1xf32> to vector<8x128xf32>
    %132 = arith.mulf %127, %131 : vector<8x128xf32>
    %c0_47 = arith.constant 0 : index
    %c0_48 = arith.constant 0 : index
    %133 = vector.load %arg6[%c0_47, %c0_48] : memref<1x128xf32, #tpu.memory_space<vmem>>, vector<1x128xf32>
    %134 = vector.broadcast %133 : vector<1x128xf32> to vector<8x128xf32>
    %135 = arith.mulf %132, %134 : vector<8x128xf32>
    %c0_49 = arith.constant 0 : index
    %c0_50 = arith.constant 0 : index
    %136 = vector.load %arg7[%c0_49, %c0_50] : memref<1x128xf32, #tpu.memory_space<vmem>>, vector<1x128xf32>
    %137 = vector.broadcast %136 : vector<1x128xf32> to vector<8x128xf32>
    %138 = arith.addf %135, %137 : vector<8x128xf32>
    %c0_51 = arith.constant 0 : index
    %c0_52 = arith.constant 0 : index
    %c0_53 = arith.constant 0 : index
    %139 = vector.load %arg8[%c0_51, %c0_52, %c0_53] : memref<1x8x128xf32, #tpu.memory_space<vmem>>, vector<1x8x128xf32>
    %140 = vector.shape_cast %139 : vector<1x8x128xf32> to vector<8x128xf32>
    %141 = vector.shape_cast %138 : vector<8x128xf32> to vector<1x8x128xf32>
    tpu.vector_store %arg8[%c0_51, %c0_52, %c0_53], %141 {strides = array<i32>} : memref<1x8x128xf32, #tpu.memory_space<vmem>>, vector<1x8x128xf32>,
    return
  }
  func.func @transform_0(%arg0: i32) -> (i32, i32, i32) {
    %c0_i32 = arith.constant 0 : i32
    %c0_i32_0 = arith.constant 0 : i32
    %c0_i32_1 = arith.constant 0 : i32
    return %arg0, %c0_i32, %c0_i32_0 : i32, i32, i32
  }
  func.func @transform_1(%arg0: i32) -> (i32, i32) {
    %c0_i32 = arith.constant 0 : i32
    %c0_i32_0 = arith.constant 0 : i32
    %c0_i32_1 = arith.constant 0 : i32
    return %c0_i32, %c0_i32_0 : i32, i32
  }
  func.func @transform_2(%arg0: i32) -> (i32, i32) {
    %c0_i32 = arith.constant 0 : i32
    %c0_i32_0 = arith.constant 0 : i32
    %c0_i32_1 = arith.constant 0 : i32
    return %c0_i32, %c0_i32_0 : i32, i32
  }
  func.func @transform_3(%arg0: i32) -> (i32, i32) {
    %c0_i32 = arith.constant 0 : i32
    %c0_i32_0 = arith.constant 0 : i32
    %c0_i32_1 = arith.constant 0 : i32
    return %c0_i32, %c0_i32_0 : i32, i32
  }
  func.func @transform_4(%arg0: i32) -> (i32, i32) {
    %c0_i32 = arith.constant 0 : i32
    %c0_i32_0 = arith.constant 0 : i32
    %c0_i32_1 = arith.constant 0 : i32
    return %c0_i32, %c0_i32_0 : i32, i32
  }
  func.func @transform_5(%arg0: i32) -> (i32, i32) {
    %c0_i32 = arith.constant 0 : i32
    %c0_i32_0 = arith.constant 0 : i32
    %c0_i32_1 = arith.constant 0 : i32
    return %c0_i32, %c0_i32_0 : i32, i32
  }
  func.func @transform_6(%arg0: i32) -> (i32, i32) {
    %c0_i32 = arith.constant 0 : i32
    %c0_i32_0 = arith.constant 0 : i32
    %c0_i32_1 = arith.constant 0 : i32
    return %c0_i32, %c0_i32_0 : i32, i32
  }
  func.func @transform_7(%arg0: i32) -> (i32, i32, i32) {
    %c0_i32 = arith.constant 0 : i32
    %c0_i32_0 = arith.constant 0 : i32
    %c0_i32_1 = arith.constant 0 : i32
    return %arg0, %c0_i32, %c0_i32_0 : i32, i32, i32
  }
}

</mosaic_0001>

<bundles_post_ra>
// kernel: tpu_custom_call.1
= control target key start
LH: loop header
LB: loop body
LE: loop exit
PB: predicated region body
PF: predicated region fallthrough
CT: control target
= control target key end

     0   :  { %12 = vsyncpa [#allocation4], 0  ;;  %s2519_s0 = inlined_call_operand.hbm [shape: f32[2,8,128], index: 0, kind: input, shape index: {}]   ;;  %s2520_s1 = inlined_call_operand.hbm [shape: bf16[128,384], index: 1, kind: input, shape index: {}]   ;;  %s2521_s2 = inlined_call_operand.hbm [shape: f32[1,384], index: 2, kind: input, shape index: {}]   ;;  %s2522_s3 = inlined_call_operand.hbm [shape: bf16[128,128], index: 3, kind: input, shape index: {}]   ;;  %s2523_s4 = inlined_call_operand.hbm [shape: f32[1,128], index: 4, kind: input, shape index: {}]   ;;  %s2524_s5 = inlined_call_operand.hbm [shape: f32[1,128], index: 5, kind: input, shape index: {}]   ;;  %s2525_s6 = inlined_call_operand.hbm [shape: f32[1,128], index: 6, kind: input, shape index: {}]   ;;  %s2526_s7 = inlined_call_operand.hbm [shape: f32[2,8,128], index: 7, kind: output, shape index: {}]  }
   0x1   :  { %14 = vsyncpa [#allocation4 + $0x1], 0 }
   0x2   :  { %15 = vsyncpa [#allocation7], 0 }
   0x3   :  { %16 = vsyncpa [#allocation10], 0 }
   0x4   :  { %17 = vsyncpa [#allocation13], 0 }
   0x5   :  { %18 = vsyncpa [#allocation5], 0 }
   0x6   :  { %20 = vsyncpa [#allocation5 + $0x1], 0  ;;  %s2090_s24 = smov 0   ;;  %s2092_s25 = smov 0  }
   0x7   :  { %s2094_s26 = smov 0   ;;  %s2096_s27 = smov 0  }
   0x8 LB: > { %s2032_s28 = smov [#allocation6]   ;;  %s2111_s30 = sadd.s32 4294967295, %s2030_s27   ;;  %s2030_s27 = sphi %s2096_s27, %s2552_s27   ;;  %s2026_s26 = sphi %s2094_s26, %s2551_s26   ;;  %s2022_s25 = sphi %s2092_s25, %s2550_s25   ;;  %s2018_s24 = sphi %s2090_s24, %s2549_s24  }
   0x9   : > { %s221_s29 = sshll.u32 %s2032_s28, 4  ;;  %p1391_p0 = scmp.ge.s32.totalorder %s2030_s27, 1  ;;  %s2116_s29 = int_to_ptr.vmem [resolvable:$true] %s221_s29 }
   0xa   : > { %p2527_p1 = scmp.eq.s32.totalorder %s2111_s30, 0  ;;  %p209_p2 = scmp.lt.s32.totalorder %s2030_s27, 3 }
   0xb   : > { %s2033_s9 = smov [#allocation9]   ;;  %s2034_s12 = smov [#allocation12]  }
   0xc   : > { %p2118_p3 = pnand %p1391_p0, %p209_p2  ;;  %s245_s10 = sshll.u32 %s2033_s9, 4  ;;  %s2131_s10 = int_to_ptr.vmem [resolvable:$true] %s245_s10 }
   0xd   : > { %s2133_s13 = sshll.u32 %s2034_s12, 4  ;;  %s1754_s16 = scalar_lea.hbm %s2520_s1, 3072  ;;  %s271_s13 = int_to_ptr.vmem [resolvable:$true] %s2133_s13 }
   0xe   : > { %s2530_s8 = scalar_select %p2118_p3, 1, 0 }
   0xf   : > { %p1607_p5 = pneg %p2118_p3  ;;  %p1755_p7 = scmp.ne.s32.totalorder %s2520_s1, %s1754_s16 }
  0x10   : > { %p1761_p11 = scmp.lt.u32.totalorder %s1754_s16, %s2520_s1 }
  0x11   : > { %p2127_p6 = pnand %p1607_p5, %p2527_p1 }
  0x13   : > { %p2143_p8 = pneg %p2127_p6 }
  0x15   : > { %p1757_p9 = pnand %p2143_p8, %p1755_p7 }
  0x17   : > { %p1758_p10 = pneg %p1757_p9 }
  0x19   : > { %p1763_p12 = pnand %p1761_p11, %p1758_p10 }
  0x1b   : > { %1766 = shalt.err (!%p1763_p12)
}
  0x1c   : > { %s1767_s22 = scalar_lea.vmem %s2116_s29, 3072  ;;  %p1775_p5 = scmp.lt.s32.totalorder %s2116_s29, %s2116_s29 }
  0x1d   : > { %p1768_p13 = scmp.ne.s32.totalorder %s2116_s29, %s1767_s22  ;;  %p1776_p4 = scmp.lt.s32.totalorder %s1767_s22, %s1767_s22 }
  0x1f   : > { %p1770_p0 = pnand %p1768_p13, %p2143_p8  ;;  %p1777_p7 = por %p1776_p4, %p1775_p5 }
  0x21   : > { %p1771_p2 = pneg %p1770_p0 }
  0x23   : > { %p1778_p9 = pnand %p1777_p7, %p1771_p2 }
  0x25   : > { %1781 = shalt.err (!%p1778_p9)
}
  0x26   : > { %s2035_s23 = smov 192   ;;  %s2036_s28 = smov 12  }
  0x27   : > { %1610 = dma.hbm_to_vmem [thread:$0]  (!%p2127_p6), %s2520_s1, 3072, %s2116_s29, [#allocation7], %s2035_s23, %s2035_s23, %s2036_s28  }
  0x28   : > { %s1782_s16 = scalar_lea.hbm %s2522_s3, 1024 }
  0x29   : > { %p1783_p4 = scmp.ne.s32.totalorder %s2522_s3, %s1782_s16  ;;  %p1789_p12 = scmp.lt.u32.totalorder %s1782_s16, %s2522_s3 }
  0x2b   : > { %p1785_p10 = pnand %p1783_p4, %p2143_p8 }
  0x2d   : > { %p1786_p11 = pneg %p1785_p10 }
  0x2f   : > { %p1791_p13 = pnand %p1789_p12, %p1786_p11 }
  0x31   : > { %1794 = shalt.err (!%p1791_p13)
}
  0x32   : > { %s1795_s29 = scalar_lea.vmem %s2131_s10, 1024  ;;  %p1803_p7 = scmp.lt.s32.totalorder %s2131_s10, %s2131_s10 }
  0x33   : > { %p1796_p0 = scmp.ne.s32.totalorder %s2131_s10, %s1795_s29  ;;  %p1804_p9 = scmp.lt.s32.totalorder %s1795_s29, %s1795_s29 }
  0x35   : > { %p1798_p2 = pnand %p1796_p0, %p2143_p8  ;;  %p1805_p4 = por %p1804_p9, %p1803_p7 }
  0x37   : > { %p1799_p5 = pneg %p1798_p2 }
  0x39   : > { %p1806_p10 = pnand %p1805_p4, %p1799_p5 }
  0x3b   : > { %1809 = shalt.err (!%p1806_p10)
}
  0x3c   : > { %s2037_s22 = smov 64   ;;  %s2038_s23 = smov 4  }
  0x3d   : > { %1616 = dma.hbm_to_vmem [thread:$0]  (!%p2127_p6), %s2522_s3, 1024, %s2131_s10, [#allocation10], %s2037_s22, %s2037_s22, %s2038_s23  }
  0x3e   : > { %s1810_s15 = scalar_lea.hbm %s2524_s5, 16 }
  0x3f   : > { %p1811_p11 = scmp.ne.s32.totalorder %s2524_s5, %s1810_s15  ;;  %p1817_p0 = scmp.lt.u32.totalorder %s1810_s15, %s2524_s5 }
  0x41   : > { %p1813_p12 = pnand %p1811_p11, %p2143_p8 }
  0x43   : > { %p1814_p13 = pneg %p1813_p12 }
  0x45   : > { %p1819_p2 = pnand %p1817_p0, %p1814_p13 }
  0x47   : > { %1822 = shalt.err (!%p1819_p2)
}
  0x48   : > { %s1823_s21 = scalar_lea.vmem %s271_s13, 16  ;;  %s1830_s10 = scalar_lea.vmem %s271_s13, 32 }
  0x49   : > { %p1824_p5 = scmp.ne.s32.totalorder %s271_s13, %s1823_s21  ;;  %p1831_p4 = scmp.lt.s32.totalorder %s271_s13, %s271_s13 }
  0x4a   : > { %p1832_p10 = scmp.lt.s32.totalorder %s1830_s10, %s1823_s21 }
  0x4b   : > { %p1826_p7 = pnand %p1824_p5, %p2143_p8 }
  0x4c   : > { %p1833_p1 = por %p1832_p10, %p1831_p4 }
  0x4d   : > { %p1827_p9 = pneg %p1826_p7 }
  0x4f   : > { %p1834_p3 = pnand %p1833_p1, %p1827_p9 }
  0x51   : > { %1837 = shalt.err (!%p1834_p3)
}
  0x52   : > { %1622 = dma.hbm_to_vmem [thread:$0]  (!%p2127_p6), %s2524_s5, 16, %s271_s13, [#allocation13]  }
  0x53   : > { %s2039_s23 = smov [#allocation8]   ;;  %s2040_s9 = smov [#allocation11]  }
  0x54   : > { %s235_s28 = sshll.u32 %s2039_s23, 4  ;;  %s259_s12 = sshll.u32 %s2040_s9, 4  ;;  %s236_s28 = int_to_ptr.vmem [resolvable:$true] %s235_s28  ;;  %s260_s12 = int_to_ptr.vmem [resolvable:$true] %s259_s12 }
  0x55   : > { %s1838_s16 = scalar_lea.hbm %s2521_s2, 48 }
  0x56   : > { %p1839_p1 = scmp.ne.s32.totalorder %s2521_s2, %s1838_s16  ;;  %p1845_p12 = scmp.lt.u32.totalorder %s1838_s16, %s2521_s2 }
  0x58   : > { %p1841_p3 = pnand %p1839_p1, %p2143_p8 }
  0x5a   : > { %p1842_p11 = pneg %p1841_p3 }
  0x5c   : > { %p1847_p13 = pnand %p1845_p12, %p1842_p11 }
  0x5e   : > { %1850 = shalt.err (!%p1847_p13)
}
  0x5f   : > { %s1851_s13 = scalar_lea.vmem %s236_s28, 48  ;;  %s1858_s10 = scalar_lea.vmem %s236_s28, 64 }
  0x60   : > { %p1852_p0 = scmp.ne.s32.totalorder %s236_s28, %s1851_s13  ;;  %p1859_p7 = scmp.lt.s32.totalorder %s236_s28, %s236_s28 }
  0x61   : > { %p1860_p9 = scmp.lt.s32.totalorder %s1858_s10, %s1851_s13 }
  0x62   : > { %p1854_p2 = pnand %p1852_p0, %p2143_p8 }
  0x63   : > { %p1861_p4 = por %p1860_p9, %p1859_p7 }
  0x64   : > { %p1855_p5 = pneg %p1854_p2 }
  0x66   : > { %p1862_p10 = pnand %p1861_p4, %p1855_p5 }
  0x68   : > { %1865 = shalt.err (!%p1862_p10)
}
  0x69   : > { %1613 = dma.hbm_to_vmem [thread:$0]  (!%p2127_p6), %s2521_s2, 48, %s236_s28, [#allocation7]  }
  0x6a   : > { %s1866_s14 = scalar_lea.hbm %s2523_s4, 16 }
  0x6b   : > { %p1867_p1 = scmp.ne.s32.totalorder %s2523_s4, %s1866_s14  ;;  %p1873_p12 = scmp.lt.u32.totalorder %s1866_s14, %s2523_s4 }
  0x6d   : > { %p1869_p3 = pnand %p1867_p1, %p2143_p8 }
  0x6f   : > { %p1870_p11 = pneg %p1869_p3 }
  0x71   : > { %p1875_p13 = pnand %p1873_p12, %p1870_p11 }
  0x73   : > { %1878 = shalt.err (!%p1875_p13)
}
  0x74   : > { %s1879_s20 = scalar_lea.vmem %s260_s12, 16  ;;  %s1886_s28 = scalar_lea.vmem %s260_s12, 32 }
  0x75   : > { %p1880_p0 = scmp.ne.s32.totalorder %s260_s12, %s1879_s20  ;;  %p1887_p7 = scmp.lt.s32.totalorder %s260_s12, %s260_s12 }
  0x76   : > { %p1888_p9 = scmp.lt.s32.totalorder %s1886_s28, %s1879_s20 }
  0x77   : > { %p1882_p2 = pnand %p1880_p0, %p2143_p8 }
  0x78   : > { %p1889_p4 = por %p1888_p9, %p1887_p7 }
  0x79   : > { %p1883_p5 = pneg %p1882_p2 }
  0x7b   : > { %p1890_p10 = pnand %p1889_p4, %p1883_p5 }
  0x7d   : > { %1893 = shalt.err (!%p1890_p10)
}
  0x7e   : > { %1619 = dma.hbm_to_vmem [thread:$0]  (!%p2127_p6), %s2523_s4, 16, %s260_s12, [#allocation10]  }
  0x7f   : > { %s2041_s10 = smov [#allocation14]   ;;  %s1894_s9 = scalar_lea.hbm %s2525_s6, 16 }
  0x80   : > { %s281_s29 = sshll.u32 %s2041_s10, 4  ;;  %p1895_p1 = scmp.ne.s32.totalorder %s2525_s6, %s1894_s9  ;;  %s282_s29 = int_to_ptr.vmem [resolvable:$true] %s281_s29 }
  0x81   : > { %p1901_p12 = scmp.lt.u32.totalorder %s1894_s9, %s2525_s6 }
  0x82   : > { %p1897_p3 = pnand %p1895_p1, %p2143_p8 }
  0x84   : > { %p1898_p11 = pneg %p1897_p3 }
  0x86   : > { %p1903_p13 = pnand %p1901_p12, %p1898_p11 }
  0x88   : > { %1906 = shalt.err (!%p1903_p13)
}
  0x89   : > { %s1907_s12 = scalar_lea.vmem %s282_s29, 16  ;;  %s1914_s18 = scalar_lea.vmem %s282_s29, 32 }
  0x8a   : > { %p1908_p0 = scmp.ne.s32.totalorder %s282_s29, %s1907_s12  ;;  %p1915_p7 = scmp.lt.s32.totalorder %s282_s29, %s282_s29 }
  0x8b   : > { %p1916_p9 = scmp.lt.s32.totalorder %s1914_s18, %s1907_s12 }
  0x8c   : > { %p1910_p2 = pnand %p1908_p0, %p2143_p8 }
  0x8d   : > { %p1917_p4 = por %p1916_p9, %p1915_p7 }
  0x8e   : > { %p1911_p5 = pneg %p1910_p2 }
  0x90   : > { %p1918_p10 = pnand %p1917_p4, %p1911_p5 }
  0x92   : > { %1921 = shalt.err (!%p1918_p10)
}
  0x93   : > { %1625 = dma.hbm_to_vmem [thread:$0]  (!%p2127_p6), %s2525_s6, 16, %s282_s29, [#allocation13]  }
  0x94   : > { %s1390_s19 = sadd.s32 4294967294, %s2030_s27   ;;  %s2262_s11 = sadd.s32 1, %s2030_s27  }
  0x95   : > { %s30_s21 = ssub.s32 %s2030_s27, %s2262_s11  ;;  %s33_s13 = sadd.s32 1, %s2026_s26 }
  0x96   : > { %p31_p8 = scmp.eq.s32.totalorder %s30_s21, 0  ;;  %p40_p1 = scmp.ne.s32.totalorder %s2026_s26, %s2022_s25 }
  0x97   : > { %p41_p3 = scmp.eq.s32.totalorder %s2030_s27, 0  ;;  %p46_p11 = scmp.ne.s32.totalorder %s2022_s25, %s2018_s24 }
  0x98   : > { %s2273_s10 = scalar_select %p31_p8, %s2026_s26, %s33_s13  }
  0x99   : > { %p2275_p12 = por %p41_p3, %p40_p1  ;;  %p2534_p13 = scmp.eq.s32.totalorder %s2111_s30, 0 }
  0x9a   : > { %p196_p0 = scmp.eq.s32.totalorder %s2111_s30, 1  ;;  %p202_p2 = scmp.eq.s32.totalorder %s1390_s19, 1 }
  0x9b   : > { %p2281_p6 = por %p2534_p13, %p46_p11  ;;  %p1640_p5 = scmp.lt.s32.totalorder %s2030_s27, 2 }
  0x9c   : > { %s292_s23 = sand.u32 1, %s2026_s26   ;;  %p2288_p7 = por %p196_p0, %p40_p1 }
  0x9d   : > { %p2292_p9 = por %p202_p2, %p46_p11  ;;  %s1399_s15 = sshll.u32 %s292_s23, 3 }
  0x9e   : > { %s2536_s9 = scalar_select %p2288_p7, 1, 0 }
  0x9f   : > { %s2537_s14 = scalar_select %p2292_p9, 1, 0 }
  0xa0   : > { %s1400_s16 = sshll.u32 %s2030_s27, 7  ;;  %s296_s20 = scalar_lea.vmem [#allocation3], %s1399_s15 }
  0xa1   : > { %s2300_s18 = scalar_lea.hbm %s2519_s0, %s1400_s16  ;;  %s303_s28 = sshll.u32 %s296_s20, 4  ;;  %s2302_s28 = int_to_ptr.vmem [resolvable:$true] %s303_s28 }
  0xa2   : > { %p2306_p4 = pnand %p1640_p5, %p2275_p12  ;;  %s293_s21 = scalar_lea.sflag [#allocation4], %s292_s23 }
  0xa3   : > { %s1922_s13 = scalar_lea.hbm %s2300_s18, 128  ;;  %s1927_s17 = scalar_lea.hbm %s2519_s0, 256 }
  0xa4   : > { %p1923_p10 = scmp.ne.s32.totalorder %s2300_s18, %s1922_s13  ;;  %p1924_p8 = pneg %p2306_p4 }
  0xa5   : > { %p1928_p11 = scmp.lt.u32.totalorder %s2300_s18, %s2519_s0  ;;  %p1929_p12 = scmp.lt.u32.totalorder %s1927_s17, %s1922_s13 }
  0xa6   : > { %p1925_p1 = pnand %p1924_p8, %p1923_p10  ;;  %p1931_p0 = scmp.lt.u32.totalorder %s1922_s13, %s2300_s18 }
  0xa7   : > { %p1930_p13 = por %p1929_p12, %p1928_p11 }
  0xa8   : > { %p1926_p3 = pneg %p1925_p1 }
  0xa9   : > { %p1932_p2 = por %p1931_p0, %p1930_p13 }
  0xab   : > { %p1933_p5 = pnand %p1932_p2, %p1926_p3 }
  0xad   : > { %1936 = shalt.err (!%p1933_p5)
}
  0xae   : > { %s1937_s23 = scalar_lea.vmem %s2302_s28, 128  ;;  %s2042_s20 = smov [#allocation3]  }
  0xaf   : > { %p1938_p10 = scmp.ne.s32.totalorder %s2302_s28, %s1937_s23  ;;  %s1942_s15 = sshll.u32 %s2042_s20, 4  ;;  %s1943_s15 = int_to_ptr.vmem [resolvable:$false] %s1942_s15 }
  0xb0   : > { %s1944_s16 = scalar_lea.vmem %s1943_s15, 256  ;;  %p1945_p7 = scmp.lt.s32.totalorder %s2302_s28, %s1943_s15 }
  0xb1   : > { %p1940_p1 = pnand %p1938_p10, %p1924_p8  ;;  %p1946_p11 = scmp.lt.s32.totalorder %s1944_s16, %s1937_s23 }
  0xb3   : > { %p1941_p9 = pneg %p1940_p1  ;;  %p1947_p12 = por %p1946_p11, %p1945_p7 }
  0xb5   : > { %p1948_p13 = pnand %p1947_p12, %p1941_p9 }
  0xb7   : > { %1951 = shalt.err (!%p1948_p13)
}
  0xb8   : > { %1629 = dma.hbm_to_vmem [thread:$0]  (!%p2306_p4), %s2300_s18, 128, %s2302_s28, %s293_s21  }
  0xb9   : > { %p2539_p3 = scmp.ne.s32.totalorder %s2530_s8, 0 }
  0xba   : > { %s2338_s13 = sand.u32 (!%p2539_p3), 1, %s2022_s25  }
  0xbb   : > { %312 = sbr.rel (%p2539_p3) target bundleno = 2113 (0x841), region = 48  ;;  %s1402_s17 = sshll.u32 (!%p2539_p3), %s2338_s13, 3 }
  0xbc   : > { %s315_s22 = scalar_lea.sflag (!%p2539_p3), [#allocation4], %s2338_s13  ;;  %s2344_s12 = scalar_lea.vmem (!%p2539_p3), [#allocation3], %s1402_s17 }
  0xc2   : > { %1997 = dma.done.wait (%p2281_p6), %s315_s22, 128  }
  0xc3   : > { %1999 = vsyncadd (%p2281_p6), %s315_s22, 4294967168  ;;  %p2540_p7 = scmp.eq.s32.totalorder %s2111_s30, 0 }
  0xc5   : > { %2001 = dma.done.wait (%p2540_p7), [#allocation7], 3120   ;;  %p2541_p9 = pmov %p2540_p7 }
  0xc6   : > { %p2542_p4 = pmov %p2540_p7 }
  0xc7   : > { %2003 = vsyncadd (%p2541_p9), [#allocation7], 4294964176 }
  0xc8   : > { %2005 = dma.done.wait (%p2542_p4), [#allocation10], 1040   ;;  %p2543_p8 = pmov %p2542_p4 }
  0xc9   : > { %p2544_p0 = pmov %p2542_p4 }
  0xca   : > { %2007 = vsyncadd (%p2543_p8), [#allocation10], 4294966256 }
  0xcb   : > { %2009 = dma.done.wait (%p2544_p0), [#allocation13], 32   ;;  %p2545_p2 = pmov %p2544_p0 }
  0xcc   : > { %v2043_v0 = vmov 0   ;;  %v2044_v1 = vmov 0.0   ;;  %v1696_v2 = vld [vmem:[#allocation6 + $0x4] ss:$12 sps:$4 sm:$0xff]   ;;  %v1698_v3 = vld [vmem:[#allocation6] ss:$12 sps:$4 sm:$0xff]   ;;  %v410_v28 = vlaneseq }
  0xcd   : > { %2011 = vsyncadd (%p2545_p2), [#allocation13], 4294967264  ;;  %585 = vmatprep.mubr.bf16.mxu0 %v2043_v0  ;;  %1491 = vmatprep.subr.bf16.mxu1 %v2044_v1  ;;  %v1699_v4 = vld [vmem:[#allocation6 + $0x1c] ss:$12 sps:$4 sm:$0xff]   ;;  %v1701_v5 = vld [vmem:[#allocation6 + $0x18] ss:$12 sps:$4 sm:$0xff]  }
  0xce   : > { %553 = vmatprep.subr.bf16.mxu0 %v1696_v2  ;;  %v1702_v6 = vld [vmem:[#allocation6 + $0x34] ss:$12 sps:$4 sm:$0xff]   ;;  %v1704_v7 = vld [vmem:[#allocation6 + $0x30] ss:$12 sps:$4 sm:$0xff]   ;;  %v1705_v8 = vld [vmem:[#allocation6 + $0x4c] ss:$12 sps:$4 sm:$0xff]  }
  0xcf   : > { %554 = vmatpush1.bf16.msra.mxu0 %v1698_v3  ;;  %v1707_v9 = vld [vmem:[#allocation6 + $0x48] ss:$12 sps:$4 sm:$0xff]   ;;  %v1708_v11 = vld [vmem:[#allocation6 + $0x64] ss:$12 sps:$4 sm:$0xff]   ;;  %v1721_v12 = vld [vmem:[#allocation6 + $0x20] ss:$12 sps:$4 sm:$0xff]  }
  0xd0   : > { %555 = vmatprep.subr.bf16.mxu0 %v1699_v4  ;;  %v1720_v10 = vld [vmem:[#allocation6 + $0x8] ss:$12 sps:$4 sm:$0xff]   ;;  %v1710_v13 = vld [vmem:[#allocation6 + $0x60] ss:$12 sps:$4 sm:$0xff]   ;;  %v1713_v15 = vld [vmem:[#allocation6 + $0x78] ss:$12 sps:$4 sm:$0xff]  }
  0xd1   : > { %1492 = vmatpush3.bf16.msra.mxu1 %v1720_v10  ;;  %v1711_v14 = vld [vmem:[#allocation6 + $0x7c] ss:$12 sps:$4 sm:$0xff]   ;;  %v1722_v16 = vld [vmem:[#allocation6 + $0x38] ss:$12 sps:$4 sm:$0xff]   ;;  %v1714_v17 = vld [vmem:[#allocation6 + $0x94] ss:$12 sps:$4 sm:$0xff]  }
  0xd2   : > { %1493 = vmatprep.subr.bf16.mxu1 %v2044_v1  ;;  %v1723_v18 = vld [vmem:[#allocation6 + $0x50] ss:$12 sps:$4 sm:$0xff]   ;;  %v1717_v20 = vld [vmem:[#allocation6 + $0xac] ss:$12 sps:$4 sm:$0xff]   ;;  %v1724_v21 = vld [vmem:[#allocation6 + $0x68] ss:$12 sps:$4 sm:$0xff]  }
  0xd3   : > { %556 = vmatpush1.bf16.msra.mxu0 %v1701_v5  ;;  %v1716_v19 = vld [vmem:[#allocation6 + $0x90] ss:$12 sps:$4 sm:$0xff]   ;;  %v1719_v22 = vld [vmem:[#allocation6 + $0xa8] ss:$12 sps:$4 sm:$0xff]   ;;  %v1725_v24 = vld [vmem:[#allocation6 + $0x80] ss:$12 sps:$4 sm:$0xff]  }
  0xd4   : > { %557 = vmatprep.subr.bf16.mxu0 %v1702_v6  ;;  %v2368_v23 = vld [vmem:[%s2344_s12] sm:$0xff]  ;;  %vm2045_vm0 = vmmov 0   ;;  %v2383_v29 = vshrl.u32 %v410_v28, 7  ;;  %v408_v31 = vld [vmem:[#allocation8] sm:$0x7]  ;;  %vm643_vm1 = vcmask 261120  }
  0xd5   : > { %1494 = vmatpush3.bf16.msra.mxu1 %v1721_v12  ;;  %v375_v25 = vpack.c.bf16 %v2368_v23, %v2368_v23  ;;  %v1726_v26 = vld [vmem:[#allocation6 + $0x98] ss:$12 sps:$4 sm:$0xff]   ;;  %v1727_v27 = vld [vmem:[#allocation6 + $0xb0] ss:$12 sps:$4 sm:$0xff]   ;;  %1507 = vmatprep.mubr.msk.bf16.mxu1 %vm2045_vm0, %v2044_v1  ;;  %s2046_s8 = smov 96   ;;  %s2047_s29 = smov 64  }
  0xd6   : > { %1495 = vmatprep.subr.bf16.mxu1 %v2044_v1  ;;  %v412_v30 = vsub.s32 0, %v2383_v29  ;;  %v416_v32 = vsub.s32 1, %v2383_v29  ;;  %s2048_s18 = smov 32   ;;  %v420_v45 = vsub.s32 2, %v2383_v29  ;;  %vm705_vm2 = vcmask 1043456   ;;  %s1454_s28 = sshll.u32 %s2111_s30, 7 }
  0xd7   : > { %558 = vmatpush1.bf16.msra.mxu0 %v1704_v7  ;;  %v637_v61 = vand.u32 127, %v410_v28  ;;  %vm691_vm4 = vcmask 64512   ;;  %vm870_vm5 = vcmask 523520   ;;  %vm987_vm6 = vcmask 785920   ;;  %s372_s19 = scalar_lea.vmem [#allocation15], %s1402_s17  ;;  %s2475_s15 = scalar_lea.hbm %s2526_s7, %s1454_s28 }
  0xd8   : > { %559 = vmatprep.subr.bf16.mxu0 %v1705_v8  ;;  %v413_v33 = vrot.slane %v408_v31, %v412_v30  ;;  %v417_v34 = vrot.slane %v408_v31, %v416_v32  ;;  %v421_v46 = vrot.slane %v408_v31, %v420_v45  ;;  %vm1104_vm7 = vcmask 1048320   ;;  %s1263_s21 = sshll.u32 %s372_s19, 4  ;;  %s1250_s16 = scalar_lea.sflag [#allocation5], %s2338_s13  ;;  %s2477_s21 = int_to_ptr.vmem [resolvable:$true] %s1263_s21 }
  0xd9   : > { %1496 = vmatpush3.bf16.msra.mxu1 %v1722_v16  ;;  %vm638_vm3 = vcmp.gt.s32.totalorder %v637_v61, %v2383_v29  ;;  %v1729_v61 = vld [vmem:[#allocation9 + $0x8] sm:$0xff]   ;;  %s1952_s22 = scalar_lea.vmem %s2477_s21, 128  ;;  %p2546_p5 = scmp.ne.s32.totalorder %s2536_s9, 0 }
  0xda   : > { %1497 = vmatprep.subr.bf16.mxu1 %v2044_v1  ;;  %p1953_p6 = scmp.ne.s32.totalorder %s2477_s21, %s1952_s22  ;;  %s2049_s30 = smov [#allocation15]  }
  0xdb   : > { %560 = vmatpush1.bf16.msra.mxu0 %v1707_v9  ;;  %s1956_s17 = sshll.u32 %s2049_s30, 4  ;;  %s1957_s17 = int_to_ptr.vmem [resolvable:$false] %s1956_s17 }
  0xdc   : > { %561 = vmatprep.subr.bf16.mxu0 %v1708_v11  ;;  %p1954_p10 = pnand %p1953_p6, %p2546_p5  ;;  %s1958_s12 = scalar_lea.vmem %s1957_s17, 256 }
  0xdd   : > { %1498 = vmatpush3.bf16.msra.mxu1 %v1723_v18  ;;  %p1959_p11 = scmp.lt.s32.totalorder %s2477_s21, %s1957_s17  ;;  %p1960_p12 = scmp.lt.s32.totalorder %s1958_s12, %s1952_s22 }
  0xde   : > { %1499 = vmatprep.subr.bf16.mxu1 %v2044_v1  ;;  %p1955_p1 = pneg %p1954_p10 }
  0xdf   : > { %562 = vmatpush1.bf16.msra.mxu0 %v1710_v13  ;;  %p1961_p13 = por %p1960_p12, %p1959_p11 }
  0xe0   : > { %563 = vmatprep.subr.bf16.mxu0 %v1711_v14 }
  0xe1   : > { %1500 = vmatpush3.bf16.msra.mxu1 %v1724_v21  ;;  %p1962_p3 = pnand %p1961_p13, %p1955_p1 }
  0xe2   : > { %1501 = vmatprep.subr.bf16.mxu1 %v2044_v1 }
  0xe3   : > { %564 = vmatpush1.bf16.msra.mxu0 %v1713_v15 }
  0xe4   : > { %565 = vmatprep.subr.bf16.mxu0 %v1714_v17 }
  0xe5   : > { %1502 = vmatpush3.bf16.msra.mxu1 %v1725_v24 }
  0xe6   : > { %1503 = vmatprep.subr.bf16.mxu1 %v2044_v1 }
  0xe7   : > { %566 = vmatpush1.bf16.msra.mxu0 %v1716_v19 }
  0xe8   : > { %567 = vmatprep.subr.bf16.mxu0 %v1717_v20 }
  0xe9   : > { %1504 = vmatpush3.bf16.msra.mxu1 %v1726_v26 }
  0xea   : > { %1505 = vmatprep.subr.bf16.mxu1 %v2044_v1 }
  0xeb   : > { %568 = vmatpush1.bf16.msra.mxu0 %v1719_v22 }
  0xec   : > { %1535 = vmatprep.subr.bf16.mxu0 %v2044_v1 }
  0xed   : > { %1506 = vmatpush3.bf16.msra.mxu1 %v1727_v27 }
  0xee   : > { %586 = vmatmul.mubr.bf16.vlgmr.msra.gmra.mrb[0].mxu0 %v375_v25  ;;  %1511 = vmatprep.subr.bf16.mxu1 %v2044_v1 }
  0xef   : > { %1537 = vmatprep.mubr.msk.bf16.mxu0 %vm2045_vm0, %v2044_v1 }
  0xf0   : > { %1508 = vmatmul.mubr.bf16.vlgmr.msra.gmra.mrb[0].mxu1 %v375_v25 }
  0xf1   : > { %1513 = vmatprep.mubr.msk.bf16.mxu1 %vm2045_vm0, %v2044_v1 }
 0x1c1   : > { %v587_v35 = vpop.f32.mrb[0].mxu0 }
 0x1c2   : > { %v588_v36 = vadd.f32 %v587_v35, %v413_v33  ;;  %v589_v37 = vpop.f32.mrb[1].mxu0 }
 0x1c3   : > { %v590_v38 = vadd.f32 %v589_v37, %v417_v34  ;;  %v591_v39 = vpop.f32.mrb[2].mxu0  ;;  %v628_v47 = vpop.f32.mrb[0].mxu1 }
 0x1c4   : > { %v639_v40 = vmul.f32 0.17677669, %v588_v36  ;;  %v592_v41 = vpop.f32.mrb[3].mxu0  ;;  %v629_v48 = vadd.f32 %v628_v47, %v421_v46  ;;  %v1509_v49 = vpop.f32.mrb[1].mxu1 }
 0x1c5   : > { %v641_v42 = vpack.c.bf16 %v590_v38, %v590_v38  ;;  %v631_v50 = vpop.f32.mrb[2].mxu1 }
 0x1c6   : > { %v640_v43 = vpack.c.bf16 %v639_v40, %v639_v40  ;;  %v2398_v51 = vpack.c.bf16 %v629_v48, %v629_v48  ;;  %v1510_v52 = vpop.f32.mrb[3].mxu1 }
 0x1c7   : > { %v648_v44 = vsel %vm643_vm1, %v641_v42, 0 }
 0x1c8   : > { %1512 = vmatpush3.bf16.xpose.msra.mxu1 %v648_v44  ;;  %753 = vrot.lane.b32.xlu1 %v640_v43, %s2046_s8  ;;  %v707_v53 = vsel %vm705_vm2, %v2398_v51, 0 }
 0x1c9   : > { %1517 = vmatprep.subr.bf16.mxu1 %v2044_v1 }
 0x1cc   : > { %874 = vrot.lane.b32.xlu1 %v641_v42, %s2047_s29 }
 0x1cf   : > { %1514 = vmatmul.mubr.msk.bf16.vlgmr.msra.gmra.mrb[4].mxu1 %vm643_vm1, %v640_v43 }
 0x1d0   : > { %872 = vrot.lane.b32.xlu1 %v640_v43, %s2047_s29  ;;  %1519 = vmatprep.mubr.msk.bf16.mxu1 %vm2045_vm0, %v2044_v1 }
 0x1d1   : > { %1518 = vmatpush3.bf16.msra.mxu1 %v707_v53 }
 0x1d2   : > { %1523 = vmatprep.subr.bf16.mxu1 %v2044_v1 }
 0x1d4   : > { %991 = vrot.lane.b32.xlu1 %v641_v42, %s2048_s18 }
 0x1d8   : > { %989 = vrot.lane.b32.xlu1 %v640_v43, %s2048_s18 }
 0x23a   : > { %v754_v54 = vpop.permute.xlu1 %753 }
 0x23e   : > { %v875_v55 = vpop.permute.xlu1 %874 }
 0x23f   : > { %v880_v56 = vsel %vm643_vm1, %v875_v55, 0 }
 0x240   : > { %1536 = vmatpush3.bf16.xpose.msra.mxu0 %v880_v56 }
 0x241   : > { %1547 = vmatprep.subr.bf16.mxu0 %v2044_v1 }
 0x242   : > { %v873_v57 = vpop.permute.xlu1 %872 }
 0x246   : > { %v992_v58 = vpop.permute.xlu1 %991 }
 0x247   : > { %v997_v59 = vsel %vm643_vm1, %v992_v58, 0  ;;  %1538 = vmatmul.mubr.msk.bf16.vlgmr.msra.gmra.mrb[4].mxu0 %vm643_vm1, %v873_v57 }
 0x248   : > { %1548 = vmatpush3.bf16.xpose.msra.mxu0 %v997_v59  ;;  %1549 = vmatprep.mubr.msk.bf16.mxu0 %vm2045_vm0, %v2044_v1 }
 0x249   : > { %1559 = vmatprep.subr.bf16.mxu0 %v2044_v1 }
 0x24a   : > { %v990_v60 = vpop.permute.xlu1 %989 }
 0x24f   : > { %1550 = vmatmul.mubr.msk.bf16.vlgmr.msra.gmra.mrb[8].mxu0 %vm643_vm1, %v990_v60  ;;  %v1728_v60 = vld [vmem:[#allocation9] sm:$0xff]  }
 0x250   : > { %1575 = vmatprep.mubr.msk.bf16.mxu0 %vm2045_vm0, %v2044_v1  ;;  %1560 = vmatpush3.bf16.msra.mxu0 %v1728_v60 }
 0x251   : > { %1561 = vmatprep.subr.bf16.mxu0 %v2044_v1 }
 0x254   : > { %1562 = vmatpush3.bf16.msra.mxu0 %v1729_v61 }
 0x255   : > { %1563 = vmatprep.subr.bf16.mxu0 %v2044_v1 }
 0x2a2   : > { %v684_v62 = vpop.f32.mrb[4].mxu1 }
 0x2a3   : > { %v690_v63 = vsel %vm638_vm3, -1e+30, %v684_v62  ;;  %v1515_v0 = vpop.f32.mrb[5].mxu1 }
 0x2a4   : > { %v687_v2 = vpop.f32.mrb[6].mxu1  ;;  %v692_v3 = vsel %vm691_vm4, %v690_v63, -inf }
 0x2a5   : > { %693 = vmax.xlane.f32.xlu0 %v692_v3  ;;  %v1516_v4 = vpop.f32.mrb[7].mxu1 }
 0x2a6   : > { %v1730_v4 = vld [vmem:[#allocation9 + $0x10] sm:$0xff]  }
 0x2a7   : > { %1564 = vmatpush3.bf16.msra.mxu0 %v1730_v4 }
 0x2a8   : > { %1565 = vmatprep.subr.bf16.mxu0 %v2044_v1 }
 0x2bb   : > { %756 = vrot.lane.b32.xlu0 %v641_v42, %s2046_s8 }
 0x31a   : > { %v916_v5 = vpop.f32.mrb[4].mxu0 }
 0x31b   : > { %v922_v6 = vsel %vm638_vm3, -1e+30, %v916_v5  ;;  %v1539_v7 = vpop.f32.mrb[5].mxu0  ;;  %v1731_v5 = vld [vmem:[#allocation9 + $0x18] sm:$0xff]  }
 0x31c   : > { %v919_v8 = vpop.f32.mrb[6].mxu0  ;;  %v923_v9 = vsel %vm691_vm4, %v922_v6, -inf  ;;  %1566 = vmatpush3.bf16.msra.mxu0 %v1731_v5  ;;  %v1732_v7 = vld [vmem:[#allocation9 + $0x20] sm:$0xff]  }
 0x31d   : > { %v1540_v10 = vpop.f32.mrb[7].mxu0  ;;  %924 = vmax.xlane.f32.xlu0 %v923_v9  ;;  %1567 = vmatprep.subr.bf16.mxu0 %v2044_v1 }
 0x31e   : > { %v1733_v10 = vld [vmem:[#allocation9 + $0x28] sm:$0xff]  }
 0x320   : > { %1568 = vmatpush3.bf16.msra.mxu0 %v1732_v7 }
 0x321   : > { %1569 = vmatprep.subr.bf16.mxu0 %v2044_v1 }
 0x322   : > { %v1033_v11 = vpop.f32.mrb[8].mxu0 }
 0x323   : > { %v1039_v12 = vsel %vm638_vm3, -1e+30, %v1033_v11  ;;  %v1551_v13 = vpop.f32.mrb[9].mxu0 }
 0x324   : > { %v1036_v14 = vpop.f32.mrb[10].mxu0  ;;  %v1040_v15 = vsel %vm691_vm4, %v1039_v12, -inf  ;;  %1570 = vmatpush3.bf16.msra.mxu0 %v1733_v10 }
 0x325   : > { %1041 = vmax.xlane.f32.xlu1 %v1040_v15  ;;  %v1552_v16 = vpop.f32.mrb[11].mxu0  ;;  %1571 = vmatprep.subr.bf16.mxu0 %v2044_v1  ;;  %v1734_v15 = vld [vmem:[#allocation9 + $0x30] sm:$0xff]  }
 0x328   : > { %1572 = vmatpush3.bf16.msra.mxu0 %v1734_v15 }
 0x329   : > { %1573 = vmatprep.subr.bf16.mxu0 %v2044_v1 }
 0x332   : > { %v694_v17 = vpop.xlane.xlu0 %693 }
 0x333   : > { %v695_v18 = vsub.f32 %v690_v63, %v694_v17  ;;  %816 = vrot.lane.b32.xlu0 %v2398_v51, %s2046_s8 }
 0x335   : > { %v696_v19 = vmul.f32 1.442695, %v695_v18  ;;  %v1735_v18 = vld [vmem:[#allocation9 + $0x38] sm:$0xff]  }
 0x336   : > { %v757_v21 = vpop.permute.xlu0 %756  ;;  %1574 = vmatpush3.bf16.msra.mxu0 %v1735_v18 }
 0x337   : > { %1736 = vpow2.f32 %v696_v19  ;;  %v762_v24 = vsel %vm643_vm1, %v757_v21, 0 }
 0x341   : > { %v1737_v20 = vpop.eup %1736 }
 0x342   : > { %v701_v22 = vpack.c.bf16 %v1737_v20, %v1737_v20  ;;  %v698_v56 = vsel %vm691_vm4, %v1737_v20, 0.0 }
 0x344   : > { %1520 = vmatmul.mubr.msk.bf16.vlgmr.msra.gmra.mrb[8].mxu1 %vm691_vm4, %v701_v22 }
 0x345   : > { %1524 = vmatpush3.bf16.xpose.msra.mxu1 %v762_v24  ;;  %1525 = vmatprep.mubr.msk.bf16.mxu1 %vm2045_vm0, %v2044_v1 }
 0x346   : > { %1529 = vmatprep.subr.bf16.mxu1 %v2044_v1 }
 0x34c   : > { %1526 = vmatmul.mubr.msk.bf16.vlgmr.msra.gmra.mrb[12].mxu1 %vm643_vm1, %v754_v54 }
 0x34d   : > { %1531 = vmatprep.mubr.msk.bf16.mxu1 %vm2045_vm0, %v2044_v1 }
 0x3aa   : > { %v925_v25 = vpop.xlane.xlu0 %924 }
 0x3ab   : > { %v926_v39 = vsub.f32 %v922_v6, %v925_v25 }
 0x3ad   : > { %v927_v40 = vmul.f32 1.442695, %v926_v39 }
 0x3ae   : > { %v817_v26 = vpop.permute.xlu0 %816 }
 0x3af   : > { %v822_v27 = vsel %vm705_vm2, %v817_v26, 0  ;;  %1738 = vpow2.f32 %v927_v40 }
 0x3b0   : > { %1530 = vmatpush3.bf16.msra.mxu1 %v822_v27 }
 0x3b1   : > { %1541 = vmatprep.subr.bf16.mxu1 %v2044_v1 }
 0x3b2   : > { %v1042_v29 = vpop.xlane.xlu1 %1041 }
 0x3b3   : > { %v1043_v43 = vsub.f32 %v1039_v12, %v1042_v29 }
 0x3b5   : > { %v1044_v46 = vmul.f32 1.442695, %v1043_v43 }
 0x3b9   : > { %v1739_v41 = vpop.eup %1738 }
 0x3ba   : > { %v929_v42 = vsel %vm691_vm4, %v1739_v41, 0.0  ;;  %v932_v57 = vpack.c.bf16 %v1739_v41, %v1739_v41 }
 0x417   : > { %v743_v28 = vpop.f32.mrb[8].mxu1 }
 0x418   : > { %v1521_v30 = vpop.f32.mrb[9].mxu1 }
 0x419   : > { %v746_v31 = vpop.f32.mrb[10].mxu1 }
 0x41a   : > { %v1522_v32 = vpop.f32.mrb[11].mxu1 }
 0x41f   : > { %v798_v33 = vpop.f32.mrb[12].mxu1 }
 0x420   : > { %v804_v34 = vsel %vm638_vm3, -1e+30, %v798_v33  ;;  %v1527_v35 = vpop.f32.mrb[13].mxu1 }
 0x421   : > { %v801_v36 = vpop.f32.mrb[14].mxu1  ;;  %v805_v37 = vsel %vm691_vm4, %v804_v34, -inf  ;;  %v1442_v35 = vld [vmem:[#allocation11] ss:$0 sm:$0xff] }
 0x422   : > { %806 = vmax.xlane.f32.xlu1 %v805_v37  ;;  %v1528_v38 = vpop.f32.mrb[15].mxu1 }
 0x433   : > { %933 = vrot.lane.b32.xlu1 %v2398_v51, %s2047_s29 }
 0x437   : > { %1050 = vrot.lane.b32.xlu1 %v2398_v51, %s2048_s18 }
 0x45b   : > { %930 = vadd.xlane.f32.xlu1 %v929_v42 }
 0x4af   : > { %v807_v44 = vpop.xlane.xlu1 %806 }
 0x4b0   : > { %v808_v45 = vsub.f32 %v804_v34, %v807_v44 }
 0x4b2   : > { %v809_v47 = vmul.f32 1.442695, %v808_v45 }
 0x4b3   : > { %v934_v49 = vpop.permute.xlu1 %933 }
 0x4b4   : > { %1740 = vpow2.f32 %v809_v47  ;;  %v939_v53 = vsel %vm705_vm2, %v934_v49, 0  ;;  %v1451_v49 = vld [vmem:[#allocation12] ss:$0 sm:$0xff] }
 0x4b5   : > { %1742 = vpow2.f32 %v1044_v46 }
 0x4b7   : > { %v1051_v55 = vpop.permute.xlu1 %1050 }
 0x4b8   : > { %v1056_v58 = vsel %vm705_vm2, %v1051_v55, 0 }
 0x4be   : > { %v1741_v48 = vpop.eup %1740 }
 0x4bf   : > { %v811_v50 = vsel %vm691_vm4, %v1741_v48, 0.0  ;;  %v814_v51 = vpack.c.bf16 %v1741_v48, %v1741_v48  ;;  %v1743_v52 = vpop.eup %1742 }
 0x4c0   : > { %812 = vadd.xlane.f32.xlu0 %v811_v50  ;;  %v1046_v54 = vsel %vm691_vm4, %v1743_v52, 0.0  ;;  %v1049_v59 = vpack.c.bf16 %v1743_v52, %v1743_v52 }
 0x4c1   : > { %1532 = vmatmul.mubr.msk.bf16.vlgmr.msra.gmra.mrb[16].mxu1 %vm691_vm4, %v814_v51  ;;  %v1452_v51 = vld [vmem:[#allocation14] ss:$0 sm:$0xff] }
 0x4c2   : > { %1542 = vmatpush3.bf16.msra.mxu1 %v939_v53  ;;  %1543 = vmatprep.mubr.msk.bf16.mxu1 %vm2045_vm0, %v2044_v1 }
 0x4c3   : > { %1553 = vmatprep.subr.bf16.mxu1 %v2044_v1 }
 0x4c4   : > { %1047 = vadd.xlane.f32.xlu0 %v1046_v54 }
 0x4c8   : > { %699 = vadd.xlane.f32.xlu0 %v698_v56 }
 0x4c9   : > { %1544 = vmatmul.mubr.msk.bf16.vlgmr.msra.gmra.mrb[20].mxu1 %vm691_vm4, %v932_v57 }
 0x4ca   : > { %1554 = vmatpush3.bf16.msra.mxu1 %v1056_v58  ;;  %1555 = vmatprep.mubr.msk.bf16.mxu1 %vm2045_vm0, %v2044_v1 }
 0x4d1   : > { %1556 = vmatmul.mubr.msk.bf16.vlgmr.msra.gmra.mrb[24].mxu1 %vm691_vm4, %v1049_v59 }
 0x4e8   : > { %v931_v6 = vpop.xlane.xlu1 %930 }
 0x54d   : > { %v813_v62 = vpop.xlane.xlu0 %812 }
 0x551   : > { %v1048_v63 = vpop.xlane.xlu0 %1047 }
 0x555   : > { %v700_v0 = vpop.xlane.xlu0 %699 }
 0x556   : > { %1744 = vrcp.f32 %v700_v0 }
 0x557   : > { %1746 = vrcp.f32 %v813_v62 }
 0x558   : > { %1748 = vrcp.f32 %v931_v6 }
 0x559   : > { %1750 = vrcp.f32 %v1048_v63 }
 0x560   : > { %v1745_v2 = vpop.eup %1744 }
 0x561   : > { %v750_v3 = vmul.f32 %v1745_v2, %v743_v28  ;;  %v1747_v8 = vpop.eup %1746 }
 0x562   : > { %v1749_v16 = vpop.eup %1748 }
 0x563   : > { %751 = vst.msk [vmem:[#allocation2] sm:$0xff] %vm643_vm1, %v750_v3  ;;  %v1751_v24 = vpop.eup %1750 }
 0x594   : > { %v858_v9 = vpop.f32.mrb[16].mxu1 }
 0x595   : > { %v865_v11 = vmul.f32 %v1747_v8, %v858_v9  ;;  %v1533_v12 = vpop.f32.mrb[17].mxu1 }
 0x596   : > { %v861_v13 = vpop.f32.mrb[18].mxu1 }
 0x597   : > { %867 = vrot.lane.b32.xlu1 %v865_v11, %s2048_s18  ;;  %v1534_v14 = vpop.f32.mrb[19].mxu1 }
 0x59c   : > { %v975_v17 = vpop.f32.mrb[20].mxu1 }
 0x59d   : > { %v982_v19 = vmul.f32 %v1749_v16, %v975_v17  ;;  %v1545_v20 = vpop.f32.mrb[21].mxu1 }
 0x59e   : > { %v978_v21 = vpop.f32.mrb[22].mxu1 }
 0x59f   : > { %984 = vrot.lane.b32.xlu0 %v982_v19, %s2047_s29  ;;  %v1546_v22 = vpop.f32.mrb[23].mxu1 }
 0x5a4   : > { %v1092_v25 = vpop.f32.mrb[24].mxu1 }
 0x5a5   : > { %v1099_v26 = vmul.f32 %v1751_v24, %v1092_v25  ;;  %v1557_v27 = vpop.f32.mrb[25].mxu1 }
 0x5a6   : > { %v1095_v28 = vpop.f32.mrb[26].mxu1 }
 0x5a7   : > { %1101 = vrot.lane.b32.xlu1 %v1099_v26, %s2046_s8  ;;  %v1558_v30 = vpop.f32.mrb[27].mxu1 }
 0x609   : > { %v868_v31 = vpop.permute.xlu1 %867 }
 0x60a   : > { %871 = vst.msk [vmem:[#allocation2] sm:$0xff] %vm870_vm5, %v868_v31 }
 0x611   : > { %v985_v32 = vpop.permute.xlu0 %984 }
 0x612   : > { %988 = vst.msk [vmem:[#allocation2] sm:$0xff] %vm987_vm6, %v985_v32 }
 0x619   : > { %v1102_v1 = vpop.permute.xlu1 %1101 }
 0x61a   : > { %1105 = vst.msk [vmem:[#allocation2] sm:$0xff] %vm1104_vm7, %v1102_v1 }
 0x621   : > { %v1106_v33 = vld [vmem:[#allocation2] sm:$0xff] }
 0x622   : > { %v1107_v34 = vpack.c.bf16 %v1106_v33, %v1106_v33 }
 0x624   : > { %1576 = vmatmul.mubr.bf16.vlgmr.msra.gmra.mrb[12].mxu0 %v1107_v34 }
 0x6f7   : > { %v1213_v36 = vpop.f32.mrb[12].mxu0 }
 0x6f8   : > { %v1214_v37 = vadd.f32 %v1442_v35, %v1213_v36  ;;  %v1577_v38 = vpop.f32.mrb[13].mxu0 }
 0x6f9   : > { %v1216_v39 = vpop.f32.mrb[14].mxu0 }
 0x6fa   : > { %v1578_v40 = vpop.f32.mrb[15].mxu0  ;;  %v1219_v41 = vadd.f32 %v1214_v37, %v2368_v23 }
 0x6fc   : > { %1220 = vadd.xlane.f32.xlu1 %v1219_v41 }
 0x789   : > { %v1221_v42 = vpop.xlane.xlu1 %1220 }
 0x78a   : > { %v1223_v29 = vmul.f32 0.0078125, %v1221_v42 }
 0x78c   : > { %v1224_v43 = vsub.f32 %v1219_v41, %v1223_v29 }
 0x78e   : > { %v1225_v44 = vmul.f32 %v1224_v43, %v1224_v43 }
 0x790   : > { %1226 = vadd.xlane.f32.xlu0 %v1225_v44 }
 0x81d   : > { %v1227_v45 = vpop.xlane.xlu0 %1226 }
 0x81e   : > { %v1228_v46 = vmul.f32 0.0078125, %v1227_v45 }
 0x820   : > { %v1229_v47 = vadd.f32 1e-05, %v1228_v46 }
 0x822   : > { %1752 = vrsqrt.f32 %v1229_v47 }
 0x82c   : > { %v1753_v48 = vpop.eup %1752 }
 0x82d   : > { %v1231_v50 = vmul.f32 %v1753_v48, %v1224_v43 }
 0x82f   : > { %v1239_v23 = vmul.f32 %v1451_v49, %v1231_v50 }
 0x831   : > { %v1247_v52 = vadd.f32 %v1452_v51, %v1239_v23 }
 0x833   : > { %1248 = vst [vmem:[%s372_s19] sm:$0xff] %v1247_v52 }
 0x834   : > { %1965 = shalt.err (!%p1962_p3)
}
 0x835   : > { %s1966_s13 = scalar_lea.hbm %s2475_s15, 128  ;;  %s1970_s18 = scalar_lea.hbm %s2526_s7, 256 }
 0x836   : > { %p1967_p7 = scmp.ne.s32.totalorder %s2475_s15, %s1966_s13  ;;  %p1971_p8 = scmp.lt.u32.totalorder %s2475_s15, %s2526_s7 }
 0x837   : > { %p1972_p0 = scmp.lt.u32.totalorder %s1970_s18, %s1966_s13  ;;  %p1974_p6 = scmp.lt.u32.totalorder %s1966_s13, %s2475_s15 }
 0x838   : > { %p1968_p9 = pnand %p1967_p7, %p2546_p5 }
 0x839   : > { %p1973_p2 = por %p1972_p0, %p1971_p8 }
 0x83a   : > { %p1969_p4 = pneg %p1968_p9 }
 0x83b   : > { %p1975_p10 = por %p1974_p6, %p1973_p2 }
 0x83d   : > { %p1976_p1 = pnand %p1975_p10, %p1969_p4 }
 0x83f   : > { %1979 = shalt.err (!%p1976_p1)
}
 0x840   : > { %1605 = dma.vmem_to_hbm [thread:$0]  (%p2546_p5), %s2477_s21, 128, %s2475_s15, %s1250_s16  }
 0x841 PF: > { %s1275_s23 = sand.u32 1, %s2018_s24   ;;  %p2547_p11 = scmp.ne.s32.totalorder %s2537_s14, 0 }
 0x842   : > { %p2548_p12 = scmp.ge.s32.totalorder %s2030_s27, 2  ;;  %s1276_s20 = scalar_lea.sflag [#allocation5], %s1275_s23 }
 0x844   : > { %p1631_p13 = pnand %p2548_p12, %p2547_p11 }
 0x846   : > { %2013 = dma.done.wait (!%p1631_p13), %s1276_s20, 128  }
 0x847   : > { %2015 = vsyncadd (!%p1631_p13), %s1276_s20, 4294967168  ;;  %p23_p3 = scmp.ge.s32.totalorder %s2262_s11, 4   ;;  %s2549_s24 = smov %s2022_s25 }
 0x848   : > { %s2550_s25 = smov %s2026_s26  ;;  %s2551_s26 = smov %s2273_s10 }
 0x849   : > { %s2552_s27 = smov %s2262_s11  ;;  %25 = sbr.rel (!%p23_p3) target bundleno = 8 (0x8), region = 117 }
 0x850   :  { %1281 = vsyncpa [#allocation4], 1 }
 0x851   :  { %1283 = vsyncpa [#allocation4 + $0x1], 1 }
 0x852   :  { %1284 = vsyncpa [#allocation7], 1 }
 0x853   :  { %1285 = vsyncpa [#allocation10], 1 }
 0x854   :  { %1286 = vsyncpa [#allocation13], 1 }
 0x855   :  { %1287 = vsyncpa [#allocation5], 1 }
 0x856   :  { %1289 = vsyncpa [#allocation5 + $0x1], 1 }

</bundles_post_ra>
